<compile_context>
chip_gen: v6e
topology: v6e:2x2x1
jax: 0.10.0
libtpu: 0.0.40
codegen_flags: <defaults>
</compile_context>

<pallas_src>
import functools
import math

import jax
import jax.numpy as jnp
from jax.experimental import pallas as pl
from jax.experimental.pallas import tpu as pltpu


# (out_channels, kernel_size) for conv1..conv11 -- matches the PyTorch module.
_LAYER_DEFS = [
    (50, 3), (30, 3), (30, 3), (20, 7), (20, 7),
    (20, 15), (20, 7), (20, 7), (10, 3), (10, 3), (1, 1),
]
_N_RELU = len(_LAYER_DEFS) - 1      # conv1..conv10 (ReLU); conv11 handled separately

# Halo rows on each side of the sequence axis inside the VMEM activation
# buffers.  Must be >= max (K-1)//2 == 7; 8 keeps all interior slices
# sublane-aligned (multiples of 8 rows).
_HALO = 8

# Channel padding inside the kernel: one native f32 lane tile.  Input channels
# (contraction pieces) AND output channels of every layer are padded to _CPAD,
# so every lane-axis concat / matmul / store is a full, aligned tile.
_CPAD = 128

# Static row offsets of each layer's weight block inside the packed weight
# buffer (layers 0.._N_RELU-1; conv11 is a single row in the misc array).
_W_OFFSETS = [0]
for _cout, _k in _LAYER_DEFS[:_N_RELU]:
    _W_OFFSETS.append(_W_OFFSETS[-1] + _k * _CPAD)
_W_ROWS = _W_OFFSETS[-1]            # 58 taps * 128 = 7424


# ----------------------------------------------------------------------------
# pltpu.roll direction probe (run once, cached).
# ----------------------------------------------------------------------------
_ROLL_SIGN = None


def _roll_sign():
    """Returns +1 if pltpu.roll matches jnp.roll (out[j] = in[j - shift]), else -1.

    The im2col tap shifts below are compile-time constants, so pinning the
    hardware rotate direction with a tiny probe removes any dependence on the
    roll sign convention.
    """
    global _ROLL_SIGN
    if _ROLL_SIGN is None:
        def probe(x_ref, o_ref):
            o_ref[...] = pltpu.roll(x_ref[...], shift=1, axis=0)

        x = jnp.tile(jnp.arange(8, dtype=jnp.float32)[:, None], (1, _CPAD))
        out = pl.pallas_call(
            probe, out_shape=jax.ShapeDtypeStruct((8, _CPAD), jnp.float32))(x)
        # jnp.roll semantics: out[1] == in[0] == 0.
        _ROLL_SIGN = 1 if float(out[1, 0]) == 0.0 else -1
    return _ROLL_SIGN


# ----------------------------------------------------------------------------
# Fused kernel.
# ----------------------------------------------------------------------------
def _net_kernel(x_ref, w_ref, misc_ref, o_ref, buf0, buf1, *, B, L, roll_sign):
    """Fused forward pass of the 11-layer Conv1d network, fully VMEM-resident.

      x_ref    : (B, L, _CPAD)          f32   channels-last input (zero-padded lanes)
      w_ref    : (_W_ROWS, _CPAD)       bf16  conv1..conv10 im2col weights, packed
      misc_ref : (12, _CPAD)            f32   rows 0..10: biases; row 11: conv11 weight
      o_ref    : (1, B*L)               f32   lane-dense sigmoid output
      buf0/1   : (B, L+2*_HALO, _CPAD)  f32   ping-pong activation buffers
    """
    nrows = L + 2 * _HALO
    misc = misc_ref[...]                                    # small, load once

    # Zero ONLY the halo rows -- interiors are always fully overwritten.
    zhalo = jnp.zeros((B, _HALO, _CPAD), jnp.float32)
    buf0[:, :_HALO, :] = zhalo
    buf0[:, _HALO + L:, :] = zhalo
    buf1[:, :_HALO, :] = zhalo
    buf1[:, _HALO + L:, :] = zhalo
    buf0[:, _HALO:_HALO + L, :] = x_ref[...]

    src, dst = buf0, buf1

    # conv1..conv10: roll-based im2col -> one bf16 MXU matmul -> bias -> ReLU.
    for i in range(_N_RELU):
        _cout, K = _LAYER_DEFS[i]
        pad = (K - 1) // 2
        # One full-buffer load; tap shifts are XLU sublane rotations of that
        # value (no per-tap unaligned VMEM slice copies).  The 2-D reshape is
        # a free retile (nrows is a multiple of 8); each batch slab keeps its
        # own >=pad zero halo, so the cyclic rotation never leaks across
        # batches in the interior rows we actually read.
        full2 = src[...].reshape(B * nrows, _CPAD)
        pieces = []
        for k in range(K):
            s = (roll_sign * (pad - k)) % (B * nrows)
            rolled = full2 if s == 0 else pltpu.roll(full2, shift=s, axis=0)
            piece = rolled.reshape(B, nrows, _CPAD)[:, _HALO:_HALO + L, :]
            pieces.append(piece.reshape(B * L, _CPAD))      # aligned, free
        patches = jnp.concatenate(pieces, axis=-1)           # (B*L, K*_CPAD)

        w_blk = w_ref[_W_OFFSETS[i]:_W_OFFSETS[i + 1], :]    # (K*_CPAD, _CPAD) bf16
        acc = jax.lax.dot_general(                            # one MXU matmul / layer
            patches.astype(jnp.bfloat16), w_blk,
            dimension_numbers=(((1,), (0,)), ((), ())),
            preferred_element_type=jnp.float32)               # (B*L, _CPAD) f32

        bias = misc[i:i + 1, :]                               # (1, _CPAD), padded lanes 0
        act = jnp.maximum(acc + bias, 0.0)                    # bias + ReLU in f32
        # Full-lane-width interior store: padded output channels are
        # ReLU(0 + 0) = 0, so the next layer never sees stale data.
        dst[:, _HALO:_HALO + L, :] = act.reshape(B, L, _CPAD)
        src, dst = dst, src

    # dropout: identity in inference mode.
    # TODO(synk): training-mode dropout not implemented.

    # conv11 (1x1, Cout=1) + sigmoid as ONE lane-dense matmul over all B*L
    # positions: (1, C) x (B*L, C)^T -> (1, B*L); one bias, one sigmoid, one store.
    flat = src[:, _HALO:_HALO + L, :].reshape(B * L, _CPAD)   # (B*L, 128) f32
    w_row = misc[_N_RELU + 1:_N_RELU + 2, :]                  # (1, 128) conv11 weight
    b_last = misc[_N_RELU:_N_RELU + 1, 0:1]                   # (1, 1)   conv11 bias
    logits = jax.lax.dot_general(
        w_row, flat, dimension_numbers=(((1,), (1,)), ((), ())),
        preferred_element_type=jnp.float32)                   # (1, B*L)
    o_ref[...] = jax.nn.sigmoid(logits + b_last)


def _full_block(arr):
    """Whole-array BlockSpec (single grid step)."""
    nd = arr.ndim
    return pl.BlockSpec(tuple(arr.shape), lambda nd=nd: (0,) * nd)


def net_forward(x_nchw1, packed):
    """Forward pass matching Net.forward (inference mode).

    x_nchw1: (B, C_in, L, 1)  -- same layout as the PyTorch module input.
    packed:  (w_all, misc) from pack_params().
    returns: (B, L) sigmoid outputs (== PyTorch x.flatten(start_dim=1)).
    """
    w_all, misc = packed
    assert all((k - 1) // 2 <= _HALO for _, k in _LAYER_DEFS), "halo too small"

    x = jnp.squeeze(x_nchw1, axis=-1)            # (B, C, L)
    x = jnp.transpose(x, (0, 2, 1))              # channels-last (B, L, C)
    B, L, cin0 = x.shape
    assert cin0 <= _CPAD and B * L <= _CPAD      # single-step demo-size kernel
    # Zero-pad channels to a full lane tile: the kernel's input write then
    # covers all 128 lanes (no stale interior lanes, lane-dense input DMA).
    x = jnp.pad(x, ((0, 0), (0, 0), (0, _CPAD - cin0)))

    kernel = functools.partial(_net_kernel, B=B, L=L, roll_sign=_roll_sign())
    out = pl.pallas_call(
        kernel,
        out_shape=jax.ShapeDtypeStruct((1, B * L), jnp.float32),
        # Tiny problem (< 2 MiB resident): single grid step, full-array blocks,
        # whole fused network stays in VMEM.
        in_specs=[_full_block(x), _full_block(w_all), _full_block(misc)],
        out_specs=pl.BlockSpec((1, B * L), lambda: (0, 0)),
        scratch_shapes=[
            pltpu.VMEM((B, L + 2 * _HALO, _CPAD), jnp.float32),
            pltpu.VMEM((B, L + 2 * _HALO, _CPAD), jnp.float32),
        ],
    )(x, w_all, misc)
    return out.reshape(B, L)


# ----------------------------------------------------------------------------
# Parameters (deterministic, PyTorch-default-style init) + packing.
# ----------------------------------------------------------------------------
def init_params(in_features, key):
    """PyTorch-layout params: per layer (w: (Cout, Cin, K), b: (Cout,))."""
    params = []
    cin = in_features
    for cout, k in _LAYER_DEFS:
        key, kw, kb = jax.random.split(key, 3)
        bound = 1.0 / math.sqrt(cin * k)
        w = jax.random.uniform(kw, (cout, cin, k), jnp.float32, -bound, bound)
        b = jax.random.uniform(kb, (cout,), jnp.float32, -bound, bound)
        params.append((w, b))
        cin = cout
    return params


def pack_params(params_pt):
    """Pack PyTorch-layout params into the kernel's fused layout.

    Returns (w_all, misc):
      w_all: (_W_ROWS, _CPAD) bf16 -- conv1..conv10 weights, im2col-flattened
             (row = tap*_CPAD + cin, col = cout).  The zero padding in BOTH
             channel dims is load-bearing: zero columns make padded output
             channels exactly 0 after ReLU(0+0) (next layer sees no stale
             lanes), zero rows make padded input lanes contribute nothing.
      misc:  (12, _CPAD) f32 -- rows 0..10: per-layer biases (zero-padded);
             row 11: the conv11 (1x1, Cout=1) weight as a channel row.
    """
    n = len(params_pt)
    assert n == len(_LAYER_DEFS)
    w_blocks, misc_rows = [], []
    w11_row = None
    for i, (w, b) in enumerate(params_pt):
        cout, cin, k = w.shape
        assert cout <= _CPAD and cin <= _CPAD
        if i < n - 1:
            w_t = jnp.transpose(w, (2, 1, 0))                               # (K, Cin, Cout)
            w_t = jnp.pad(w_t, ((0, 0), (0, _CPAD - cin), (0, _CPAD - cout)))
            w_blocks.append(w_t.reshape(k * _CPAD, _CPAD))
        else:
            assert k == 1 and cout == 1
            w11_row = jnp.pad(w[0, :, 0], (0, _CPAD - cin))                 # (128,)
        misc_rows.append(jnp.pad(b, (0, _CPAD - cout)))
    misc_rows.append(w11_row)
    w_all = jnp.concatenate(w_blocks, axis=0).astype(jnp.bfloat16)
    assert w_all.shape == (_W_ROWS, _CPAD)
    misc = jnp.stack(misc_rows, axis=0).astype(jnp.float32)                 # (12, 128)
    return w_all, misc


def net_forward_reference(x_nchw1, params_pt):
    """Pure-JAX/XLA reference (no Pallas), numerically matched to the kernel:
    conv1..conv10 use bf16 operands with f32 accumulation; conv11 stays f32."""
    x = jnp.squeeze(x_nchw1, axis=-1)                       # (B, C, L)
    n = len(params_pt)
    for i, (w, b) in enumerate(params_pt):
        k = w.shape[-1]
        pad = (k - 1) // 2
        if i < n - 1:
            lhs, rhs = x.astype(jnp.bfloat16), w.astype(jnp.bfloat16)
        else:
            lhs, rhs = x, w
        x = jax.lax.conv_general_dilated(
            lhs, rhs, window_strides=(1,), padding=[(pad, pad)],
            dimension_numbers=("NCH", "OIH", "NCH"),
            preferred_element_type=jnp.float32)
        x = x + b[None, :, None]
        x = jnp.maximum(x, 0.0) if i < n - 1 else jax.nn.sigmoid(x)
    return x[:, 0, :]                                       # (B, L)


if __name__ == "__main__":
    B, C_IN, L = 2, 4, 16
    key = jax.random.PRNGKey(0)
    key, kx = jax.random.split(key)

    x = jax.random.normal(kx, (B, C_IN, L, 1), jnp.float32)
    params_pt = init_params(C_IN, key)
    packed = pack_params(params_pt)

    _roll_sign()                                 # pin rotate direction before tracing
    fwd = jax.jit(net_forward)
    out = jax.block_until_ready(fwd(x, packed))

    assert out.shape == (B, L), out.shape
    assert bool(jnp.all(jnp.isfinite(out)))
    assert bool(jnp.all((out >= 0.0) & (out <= 1.0)))        # sigmoid range

    # Cross-check against a pure-XLA reference using the same bf16-operand /
    # f32-accumulation matmul numerics; residual delta is accumulation order.
    ref = jax.block_until_ready(net_forward_reference(x, params_pt))
    err = float(jnp.max(jnp.abs(out - ref)))
    assert err < 1e-2, err

    print("KERNEL_OK")
</pallas_src>

<mosaic_0001>
module attributes {stable_mosaic.version = 11 : i64} {
  func.func @probe(%arg0: memref<8x128xf32, #tpu.memory_space<vmem>>, %arg1: memref<8x128xf32, #tpu.memory_space<vmem>>) attributes {dimension_semantics = [], scalar_prefetch = 0 : i64, scratch_operands = 0 : i64, tpu.core_type = #tpu.core_type<tc>} {
    %c0 = arith.constant 0 : index
    %c0_0 = arith.constant 0 : index
    %0 = vector.load %arg0[%c0, %c0_0] : memref<8x128xf32, #tpu.memory_space<vmem>>, vector<8x128xf32>
    %c1_i32 = arith.constant 1 : i32
    %1 = tpu.dynamic_rotate %0 by %c1_i32 dim 0 : vector<8x128xf32>, i32 -> vector<8x128xf32>
    %c0_1 = arith.constant 0 : index
    %c0_2 = arith.constant 0 : index
    %2 = vector.load %arg1[%c0_1, %c0_2] : memref<8x128xf32, #tpu.memory_space<vmem>>, vector<8x128xf32>
    tpu.vector_store %arg1[%c0_1, %c0_2], %1 {strides = array<i32>} : memref<8x128xf32, #tpu.memory_space<vmem>>, vector<8x128xf32>,
    return
  }
}

</mosaic_0001>

<bundles_post_ra>
// kernel: tpu_custom_call.1
= control target key start
LH: loop header
LB: loop body
LE: loop exit
PB: predicated region body
PF: predicated region fallthrough
CT: control target
= control target key end

     0   :  { %6 = vsyncpa [#allocation3], 0  ;;  %s103_s0 = inlined_call_operand.hbm [shape: f32[8,128], index: 0, kind: input, shape index: {}]   ;;  %s104_s1 = inlined_call_operand.hbm [shape: f32[8,128], index: 1, kind: output, shape index: {}]  }
   0x1   :  { %7 = vsyncpa [#allocation4], 0  ;;  %s85_s6 = smov [#allocation2]  }
   0x2   :  { %s14_s7 = sshll.u32 %s85_s6, 4  ;;  %s15_s7 = int_to_ptr.vmem [resolvable:$true] %s14_s7 }
   0x3   :  { %s49_s8 = scalar_lea.vmem %s15_s7, 128  ;;  %p54_p1 = scmp.lt.s32.totalorder %s15_s7, %s15_s7 }
   0x4   :  { %p50_p0 = scmp.ne.s32.totalorder %s15_s7, %s49_s8  ;;  %p55_p2 = scmp.lt.s32.totalorder %s49_s8, %s49_s8 }
   0x6   :  { %p56_p3 = por %p55_p2, %p54_p1 }
   0x8   :  { %p57_p4 = pnand %p56_p3, %p50_p0 }
   0xa   :  { %60 = shalt.err (!%p57_p4)
}
   0xb   :  { %17 = dma.hbm_to_vmem [thread:$0]  %s103_s0, 128, %s15_s7, [#allocation3]  }
   0xc   :  { %81 = dma.done.wait [#allocation3], 128  }
   0xd   :  { %82 = vsyncadd [#allocation3], 4294967168  ;;  %s86_s11 = smov [#allocation5]   ;;  %v21_v0 = vld [vmem:[#allocation2] sm:$0xff] }
   0xe   :  { %s30_s12 = sshll.u32 %s86_s11, 4  ;;  %v22_v1 = vrot.slane %v21_v0, 7  ;;  %s31_s12 = int_to_ptr.vmem [resolvable:$true] %s30_s12 }
   0xf   :  { %s61_s13 = scalar_lea.vmem %s31_s12, 128  ;;  %p66_p6 = scmp.lt.s32.totalorder %s31_s12, %s31_s12 }
  0x10   :  { %23 = vst [vmem:[#allocation5] sm:$0xff] %v22_v1  ;;  %p62_p5 = scmp.ne.s32.totalorder %s31_s12, %s61_s13  ;;  %p67_p7 = scmp.lt.s32.totalorder %s61_s13, %s61_s13 }
  0x12   :  { %p68_p8 = por %p67_p7, %p66_p6 }
  0x14   :  { %p69_p9 = pnand %p68_p8, %p62_p5 }
  0x16   :  { %72 = shalt.err (!%p69_p9)
}
  0x17   :  { %33 = dma.vmem_to_hbm [thread:$0]  %s31_s12, 128, %s104_s1, [#allocation4]  }
  0x18   :  { %83 = dma.done.wait [#allocation4], 128  }
  0x19   :  { %84 = vsyncadd [#allocation4], 4294967168 }
  0x1a   :  { %37 = vsyncpa [#allocation3], 1 }
  0x1b   :  { %38 = vsyncpa [#allocation4], 1 }

</bundles_post_ra>
